<compile_context>
chip_gen: v5e
topology: v5e:2x2
jax: 0.10.0
libtpu: 0.0.40
codegen_flags: <defaults>
</compile_context>

<pallas_src>
import functools

import jax
import jax.numpy as jnp
from jax.experimental import pallas as pl
from jax.experimental.pallas import tpu as pltpu


def _round_up(x, m):
    return (x + m - 1) // m * m


def _largest_divisor_leq(n, cap):
    cap = max(1, min(n, cap))
    for d in range(cap, 0, -1):
        if n % d == 0:
            return d
    return 1


def _conv_stats_kernel(p_ref, w_ref, stats_ref):
    """Pass 1: conv row-tile as one lane-dense MXU matmul + BN stat partials.

    p_ref     : (1, TH, OW, KKCp) bf16  im2col patch rows (built in wrapper)
    w_ref     : (KKCp, Cp)        bf16  im2col weight, K and C zero-padded
    stats_ref : (1, 1, 2, Cp)     f32   [sum, sum-of-squares] for this block
    """
    _, TH, OW, KKCp = p_ref.shape
    Cp = w_ref.shape[1]

    p = p_ref[...].reshape(TH * OW, KKCp)
    # One MXU matmul, f32 accumulation, lane-dense operands (KKCp, Cp % 128 == 0).
    y = jnp.dot(p, w_ref[...], preferred_element_type=jnp.float32)

    s = jnp.sum(y, axis=0, keepdims=True)                      # (1, Cp)
    ss = jnp.sum(y * y, axis=0, keepdims=True)                 # (1, Cp)
    stats_ref[...] = jnp.concatenate([s, ss], axis=0).reshape(1, 1, 2, Cp)


def _conv_bn_relu_pool_kernel(p_ref, w_ref, stats_ref, g_ref, beta_ref, o_ref,
                              *, count, eps):
    """Pass 2: recompute conv, folded BN scale/shift, ReLU, MaxPool2d(2).

    p_ref     : (1, TH, OW, KKCp) bf16   TH = 2*TPH conv rows of the patch
    w_ref     : (KKCp, Cp)        bf16
    stats_ref : (N, R1, 2, Cp)    f32    all per-block partials (resident)
    g_ref     : (1, Cp)           f32    BN gamma (channel-padded)
    beta_ref  : (1, Cp)           f32    BN beta  (channel-padded)
    o_ref     : (1, TPH, PW, Cp)  f32    pooled output rows
    """
    _, TH, OW, KKCp = p_ref.shape
    _, TPH, PW, Cp = o_ref.shape
    inv_count = 1.0 / count

    # Global BN statistics from the tiny resident partials (major-dim reduce).
    stats = jnp.sum(stats_ref[...], axis=(0, 1))               # (2, Cp)
    mean = stats[0:1, :] * inv_count
    var = jnp.maximum(stats[1:2, :] * inv_count - mean * mean, 0.0)
    scale = g_ref[...] * jax.lax.rsqrt(var + eps)              # rsqrt -> EUP
    shift = beta_ref[...] - mean * scale                       # folded shift

    # Recompute the conv matmul (MXU has slack; avoids the y_conv HBM stream).
    p = p_ref[...].reshape(TH * OW, KKCp)
    y = jnp.dot(p, w_ref[...], preferred_element_type=jnp.float32)

    # BN + ReLU on a lane-dense slab, then 2x2 max-pool (floor semantics).
    y = jnp.maximum(y * scale + shift, 0.0)
    y = y.reshape(1, TH, OW, Cp)
    a = jnp.maximum(y[:, 0:2 * TPH:2, :, :], y[:, 1:2 * TPH:2, :, :])   # pool H
    out = jnp.maximum(a[:, :, 0:2 * PW:2, :], a[:, :, 1:2 * PW:2, :])   # pool W
    o_ref[...] = out.astype(o_ref.dtype)


def block_forward(x_nchw, w_oihw, b, gamma, beta, *, stride, padding,
                  eps=1e-5, matmul_dtype=jnp.bfloat16):
    """NCHW in / NCHW out, matching PyTorch Block.forward (training-mode BN)."""
    # Conv bias cancels exactly under training-mode BatchNorm; drop it.
    del b
    N, Cin, H, W = x_nchw.shape
    Cout, _, KH, KW = w_oihw.shape

    Hp, Wp = H + 2 * padding, W + 2 * padding
    OH = (Hp - KH) // stride + 1
    OW = (Wp - KW) // stride + 1
    PH, PW = OH // 2, OW // 2
    Cp = _round_up(Cout, 128)
    KKC = KH * KW * Cin
    KKCp = _round_up(KKC, 128)

    # ---- Wrapper-side layout glue (pure plumbing) ----
    # NCHW -> NHWC, spatial pad, cast x to bf16 ONCE, then im2col: KH*KW shifted
    # windows concatenated along channels -> lane-dense (…, KKCp) bf16 patch.
    x = jnp.transpose(x_nchw, (0, 2, 3, 1))
    xp = jnp.pad(x, ((0, 0), (padding, padding), (padding, padding), (0, 0)))
    xp = xp.astype(matmul_dtype)
    cols = []
    for kh in range(KH):
        for kw in range(KW):
            cols.append(jax.lax.slice(
                xp,
                (0, kh, kw, 0),
                (N, kh + stride * (OH - 1) + 1, kw + stride * (OW - 1) + 1, Cin),
                (1, stride, stride, 1)))
    patch = jnp.concatenate(cols, axis=-1)                     # (N, OH, OW, KKC)
    patch = jnp.pad(patch, ((0, 0), (0, 0), (0, 0), (0, KKCp - KKC)))

    # (Cout,Cin,KH,KW) -> (KH,KW,Cin,Cout) -> (KKC, Cout), matching the patch's
    # (kh, kw, cin) concat order; zero-pad K to KKCp and channels to Cp.
    w2 = jnp.transpose(w_oihw, (2, 3, 1, 0)).reshape(KKC, Cout)
    w2 = jnp.pad(w2, ((0, KKCp - KKC), (0, Cp - Cout))).astype(matmul_dtype)
    g_p = jnp.pad(gamma.astype(jnp.float32), (0, Cp - Cout)).reshape(1, Cp)
    be_p = jnp.pad(beta.astype(jnp.float32), (0, Cp - Cout)).reshape(1, Cp)

    # Row tiles: a few conv rows per grid step so even N=2 yields >2 parallel
    # grid steps (feeds both v7x TensorCores) while the per-block VMEM stays
    # tiny.  For large images size TH against ~48 MiB on v7x / larger on v6e.
    TH1 = _largest_divisor_leq(OH, 8)          # pass-1 conv-row tile
    R1 = OH // TH1
    TPH = _largest_divisor_leq(PH, 4)          # pass-2 pooled-row tile
    TH2 = 2 * TPH
    R2 = PH // TPH

    cparams = pltpu.CompilerParams(
        dimension_semantics=("parallel", "parallel"),
        vmem_limit_bytes=32 * 1024 * 1024,     # safe on v7x's 64 MiB VMEM
    )

    # ---- Pass 1: conv matmul per row-block, emit ONLY BN stat partials ----
    part_stats = pl.pallas_call(
        _conv_stats_kernel,
        grid=(N, R1),
        in_specs=[
            pl.BlockSpec((1, TH1, OW, KKCp), lambda n, r: (n, r, 0, 0)),
            pl.BlockSpec((KKCp, Cp), lambda n, r: (0, 0)),
        ],
        out_specs=pl.BlockSpec((1, 1, 2, Cp), lambda n, r: (n, r, 0, 0)),
        out_shape=jax.ShapeDtypeStruct((N, R1, 2, Cp), jnp.float32),
        compiler_params=cparams,
    )(patch, w2)

    # ---- Pass 2: recompute conv, BN (folded) + ReLU + MaxPool2d(2) ----
    kernel2 = functools.partial(
        _conv_bn_relu_pool_kernel, count=float(N * OH * OW), eps=eps)
    out_p = pl.pallas_call(
        kernel2,
        grid=(N, R2),
        in_specs=[
            pl.BlockSpec((1, TH2, OW, KKCp), lambda n, r: (n, r, 0, 0)),
            pl.BlockSpec((KKCp, Cp), lambda n, r: (0, 0)),
            pl.BlockSpec((N, R1, 2, Cp), lambda n, r: (0, 0, 0, 0)),
            pl.BlockSpec((1, Cp), lambda n, r: (0, 0)),
            pl.BlockSpec((1, Cp), lambda n, r: (0, 0)),
        ],
        out_specs=pl.BlockSpec((1, TPH, PW, Cp), lambda n, r: (n, r, 0, 0)),
        out_shape=jax.ShapeDtypeStruct((N, PH, PW, Cp), jnp.float32),
        compiler_params=cparams,
    )(patch, w2, part_stats, g_p, be_p)

    # Strip channel padding, back to NCHW.
    return jnp.transpose(out_p[..., :Cout], (0, 3, 1, 2))


def block_reference(x, w, b, gamma, beta, *, stride, padding, eps=1e-5,
                    matmul_dtype=jnp.bfloat16):
    """Pure-JAX reference mirroring PyTorch semantics (conv bias INCLUDED, which
    verifies that dropping it in the kernel is exact under training-mode BN).
    Conv uses the same operand dtype as the kernel (bf16 in / f32 accumulate)."""
    y = jax.lax.conv_general_dilated(
        x.astype(matmul_dtype), w.astype(matmul_dtype), (stride, stride),
        [(padding, padding), (padding, padding)],
        dimension_numbers=("NCHW", "OIHW", "NCHW"),
        preferred_element_type=jnp.float32,
    )
    y = y + b[None, :, None, None]
    mean = jnp.mean(y, axis=(0, 2, 3), keepdims=True)
    var = jnp.mean((y - mean) ** 2, axis=(0, 2, 3), keepdims=True)
    y = (y - mean) * jax.lax.rsqrt(var + eps)
    y = y * gamma[None, :, None, None] + beta[None, :, None, None]
    y = jnp.maximum(y, 0.0)
    N, C, OH, OW = y.shape
    PH, PW = OH // 2, OW // 2
    y = y[:, :, : 2 * PH, : 2 * PW]
    return y.reshape(N, C, PH, 2, PW, 2).max(axis=(3, 5))


if __name__ == "__main__":
    # Small shapes consistent with the module.
    N, Cin, H, W = 2, 4, 16, 16
    Cout, K, stride, padding = 8, 3, 1, 1

    key = jax.random.PRNGKey(0)
    kx, kw, kb, kg, kbe = jax.random.split(key, 5)

    x = jax.random.normal(kx, (N, Cin, H, W), dtype=jnp.float32)
    # Deterministic synthetic parameters (shapes from nn.Conv2d / nn.BatchNorm2d).
    w = jax.random.normal(kw, (Cout, Cin, K, K), dtype=jnp.float32) * 0.1
    b = jax.random.normal(kb, (Cout,), dtype=jnp.float32) * 0.1
    gamma = 1.0 + 0.1 * jax.random.normal(kg, (Cout,), dtype=jnp.float32)
    beta = 0.1 * jax.random.normal(kbe, (Cout,), dtype=jnp.float32)

    out = jax.block_until_ready(
        block_forward(x, w, b, gamma, beta, stride=stride, padding=padding))
    ref = jax.block_until_ready(
        block_reference(x, w, b, gamma, beta, stride=stride, padding=padding))

    assert out.shape == (N, Cout, H // 2, W // 2), out.shape
    max_err = float(jnp.max(jnp.abs(out - ref)))
    assert jnp.allclose(out, ref, rtol=2e-3, atol=2e-3), max_err

    print("KERNEL_OK")
</pallas_src>

<mosaic_0001>
module attributes {stable_mosaic.version = 11 : i64} {
  func.func @_conv_stats_kernel(%arg0: i32, %arg1: i32, %arg2: memref<1x8x16x128xbf16, #tpu.memory_space<vmem>>, %arg3: memref<128x128xbf16, #tpu.memory_space<vmem>>, %arg4: memref<1x1x2x128xf32, #tpu.memory_space<vmem>>) attributes {dimension_semantics = [#tpu.dimension_semantics<parallel>, #tpu.dimension_semantics<parallel>], iteration_bounds = array<i64: 2, 2>, scalar_prefetch = 0 : i64, scratch_operands = 0 : i64, tpu.core_type = #tpu.core_type<tc>, window_params = [{transform_indices = @transform_0, window_bounds = array<i64: 1, 8, 16, 128>}, {pipeline_mode = #tpu.pipeline_mode<synchronous>, transform_indices = @transform_1, window_bounds = array<i64: 128, 128>}, {transform_indices = @transform_2, window_bounds = array<i64: 1, 1, 2, 128>}]} {
    %c0 = arith.constant 0 : index
    %c0_0 = arith.constant 0 : index
    %c0_1 = arith.constant 0 : index
    %c0_2 = arith.constant 0 : index
    %0 = vector.load %arg2[%c0, %c0_0, %c0_1, %c0_2] : memref<1x8x16x128xbf16, #tpu.memory_space<vmem>>, vector<1x8x16x128xbf16>
    %1 = vector.shape_cast %0 : vector<1x8x16x128xbf16> to vector<128x128xbf16>
    %c0_3 = arith.constant 0 : index
    %c0_4 = arith.constant 0 : index
    %2 = vector.load %arg3[%c0_3, %c0_4] : memref<128x128xbf16, #tpu.memory_space<vmem>>, vector<128x128xbf16>
    %cst = arith.constant dense<0.000000e+00> : vector<128x128xf32>
    %3 = tpu.matmul %1, %2, %cst {dimension_numbers = #tpu.dot_dimension_numbers<[1], [0], [0], [1], [0, 0, 1, 1], [], []>} : vector<128x128xbf16>, vector<128x128xbf16>, vector<128x128xf32> -> vector<128x128xf32>
    %cst_5 = arith.constant dense<0.000000e+00> : vector<128xf32>
    %4 = vector.multi_reduction <add>, %3, %cst_5 [0] : vector<128x128xf32> to vector<128xf32>
    %5 = vector.shape_cast %4 : vector<128xf32> to vector<1x128xf32>
    %6 = arith.mulf %3, %3 : vector<128x128xf32>
    %cst_6 = arith.constant dense<0.000000e+00> : vector<128xf32>
    %7 = vector.multi_reduction <add>, %6, %cst_6 [0] : vector<128x128xf32> to vector<128xf32>
    %8 = vector.shape_cast %7 : vector<128xf32> to vector<1x128xf32>
    %9 = tpu.concatenate %5, %8 in 0 : vector<1x128xf32>, vector<1x128xf32> -> vector<2x128xf32>
    %10 = vector.shape_cast %9 : vector<2x128xf32> to vector<1x1x2x128xf32>
    %c0_7 = arith.constant 0 : index
    %c0_8 = arith.constant 0 : index
    %c0_9 = arith.constant 0 : index
    %c0_10 = arith.constant 0 : index
    %11 = vector.load %arg4[%c0_7, %c0_8, %c0_9, %c0_10] : memref<1x1x2x128xf32, #tpu.memory_space<vmem>>, vector<1x1x2x128xf32>
    tpu.vector_store %arg4[%c0_7, %c0_8, %c0_9, %c0_10], %10 {strides = array<i32>} : memref<1x1x2x128xf32, #tpu.memory_space<vmem>>, vector<1x1x2x128xf32>,
    return
  }
  func.func @transform_0(%arg0: i32, %arg1: i32) -> (i32, i32, i32, i32) {
    %c0_i32 = arith.constant 0 : i32
    %c0_i32_0 = arith.constant 0 : i32
    %c0_i32_1 = arith.constant 0 : i32
    return %arg0, %arg1, %c0_i32, %c0_i32_0 : i32, i32, i32, i32
  }
  func.func @transform_1(%arg0: i32, %arg1: i32) -> (i32, i32) {
    %c0_i32 = arith.constant 0 : i32
    %c0_i32_0 = arith.constant 0 : i32
    %c0_i32_1 = arith.constant 0 : i32
    return %c0_i32, %c0_i32_0 : i32, i32
  }
  func.func @transform_2(%arg0: i32, %arg1: i32) -> (i32, i32, i32, i32) {
    %c0_i32 = arith.constant 0 : i32
    %c0_i32_0 = arith.constant 0 : i32
    %c0_i32_1 = arith.constant 0 : i32
    return %arg0, %arg1, %c0_i32, %c0_i32_0 : i32, i32, i32, i32
  }
}

</mosaic_0001>

<bundles_post_ra>
// kernel: tpu_custom_call.1
= control target key start
LH: loop header
LB: loop body
LE: loop exit
PB: predicated region body
PF: predicated region fallthrough
CT: control target
= control target key end

     0   :  { %s1134_s0 = inlined_call_operand.hbm [shape: bf16[2,16,16,128], index: 0, kind: input, shape index: {}]   ;;  %s1135_s1 = inlined_call_operand.hbm [shape: bf16[128,128], index: 1, kind: input, shape index: {}]   ;;  %s1136_s2 = inlined_call_operand.hbm [shape: f32[2,2,2,128], index: 2, kind: output, shape index: {}]  }
   0x1   :  { %1143 = sst [smem:[#allocation15_spill]] %s1135_s1 }
   0x2   :  { %7 = vsyncpa [#allocation3], 0 }
   0x3   :  { %9 = vsyncpa [#allocation3 + $0x1], 0 }
   0x4   :  { %10 = vsyncpa [#allocation6], 0 }
   0x5   :  { %11 = vsyncpa [#allocation4], 0 }
   0x6   :  { %13 = vsyncpa [#allocation4 + $0x1], 0  ;;  %s950_s9 = smov 0   ;;  %s952_s10 = smov 0  }
   0x7   :  { %s954_s11 = smov 0   ;;  %s956_s12 = smov 0  }
   0x8   :  { %s958_s13 = smov 0   ;;  %s960_s14 = smov 0  }
   0x9   :  { %s962_s15 = smov 0   ;;  %s964_s16 = smov 0  }
   0xa LB: > { %1144 = sst [smem:[#allocation11_spill]] %s902_s9  ;;  %s553_s17 = sadd.s32 4294967295, %s930_s16   ;;  %s930_s16 = sphi %s964_s16, %s19_s16   ;;  %s926_s15 = sphi %s962_s15, %s1167_s15   ;;  %s922_s14 = sphi %s960_s14, %s1166_s14   ;;  %s918_s13 = sphi %s958_s13, %s1165_s13   ;;  %s914_s12 = sphi %s956_s12, %s1164_s12   ;;  %s910_s11 = sphi %s954_s11, %s1163_s11   ;;  %s906_s10 = sphi %s952_s10, %s1162_s10   ;;  %s902_s9 = sphi %s950_s9, %s1161_s9  }
   0xb   : > { %s554_s18 = sadd.s32 4294967294, %s930_s16   ;;  %p53_p0 = scmp.ne.s32.totalorder %s906_s10, %s902_s9 }
   0xc   : > { %p994_p1 = scmp.eq.s32.totalorder %s553_s17, 0  ;;  %p106_p2 = scmp.eq.s32.totalorder %s554_s18, 3 }
   0xd   : > { %p555_p4 = scmp.ge.s32.totalorder %s930_s16, 1  ;;  %p113_p6 = scmp.lt.s32.totalorder %s930_s16, 5 }
   0xe   : > { %p1000_p3 = por %p994_p1, %p53_p0  ;;  %p1005_p5 = por %p106_p2, %p53_p0 }
   0xf   : > { %s1149_s1 = sld [smem:[#allocation15_spill]]  ;;  %p1013_p7 = pnand %p555_p4, %p113_p6 }
  0x10   : > { %s1147_s21 = scalar_select %p1005_p5, 1, 0 }
  0x11   : > { %p685_p8 = pneg %p1013_p7  ;;  %s932_s26 = smov [#allocation5]  }
  0x12   : > { %1148 = sst [smem:[#allocation12_spill]] %s1147_s21  ;;  %s126_s27 = sshll.u32 %s932_s26, 4  ;;  %s127_s27 = int_to_ptr.vmem [resolvable:$true] %s126_s27 }
  0x13   : > { %p686_p9 = pnand %p685_p8, %p994_p1  ;;  %s1137_s28 = smov 64  }
  0x14   : > { %s1138_s29 = smov 4   ;;  %s28_s30 = sadd.s32 1, %s922_s14 }
  0x15   : > { %s124_s24 = sshll.u32 %s1149_s1, 4  ;;  %p29_p10 = scmp.ge.s32.totalorder %s28_s30, 2  ;;  %s125_s24 = int_to_ptr.hbm [resolvable:$true] %s124_s24 }
  0x16   : > { %688 = dma.hbm_to_vmem [thread:$0]  (!%p686_p9), %s125_s24, 1024, %s127_s27, [#allocation6], %s1137_s28, %s1137_s28, %s1138_s29  }
  0x17   : > { %s31_s3 = sadd.s32 1, %s926_s15  ;;  %p100_p11 = scmp.eq.s32.totalorder %s553_s17, 3 }
  0x18   : > { %p47_p12 = scmp.ne.s32.totalorder %s910_s11, %s906_s10  ;;  %s1169_s30 = smov (%p29_p10, %s28_s30), 0 }
  0x19   : > { %1151 = sst [smem:[#allocation13_spill]] %s1169_s30  ;;  %s1171_s3 = smov (!%p29_p10, %s31_s3), %s926_s15 }
  0x1a   : > { %s40_s4 = sadd.s32 1, %s910_s11  ;;  %p48_p13 = scmp.eq.s32.totalorder %s930_s16, 0 }
  0x1b   : > { %p33_p0 = scmp.ge.s32.totalorder %s1171_s3, 2  ;;  %p1033_p2 = por %p100_p11, %p47_p12 }
  0x1c   : > { %s36_s6 = ssub.s32 %s922_s14, %s1169_s30  ;;  %p1039_p4 = por %p48_p13, %p47_p12 }
  0x1d   : > { %s1173_s3 = smov (%p33_p0, %s1171_s3), 0  ;;  %p698_p6 = scmp.lt.s32.totalorder %s930_s16, 4 }
  0x1e   : > { %1154 = sst [smem:[#allocation14_spill]] %s1173_s3  ;;  %s140_s8 = sand.u32 1, %s910_s11  }
  0x1f   : > { %s35_s17 = ssub.s32 %s926_s15, %s1173_s3  ;;  %s636_s18 = sshll.u32 %s922_s14, 4 }
  0x20   : > { %s37_s22 = sor.u32 %s36_s6, %s35_s17  ;;  %s558_s23 = sshll.u32 %s140_s8, 6 }
  0x21   : > { %p38_p8 = scmp.eq.s32.totalorder %s37_s22, 0  ;;  %s561_s24 = sshll.u32 %s926_s15, 5 }
  0x22   : > { %s144_s26 = scalar_lea.vmem [#allocation2], %s558_s23  ;;  %s150_s29 = sadd.s32 %s636_s18, %s561_s24 }
  0x23   : > { %s155_s27 = sshll.u32 %s144_s26, 4  ;;  %s562_s1 = sshll.u32 %s150_s29, 2  ;;  %s156_s27 = int_to_ptr.vmem [resolvable:$true] %s155_s27 }
  0x24   : > { %s1052_s28 = scalar_select %p38_p8, %s910_s11, %s40_s4  }
  0x25   : > { %p690_p9 = pnand %p698_p6, %p1039_p4  ;;  %s152_s9 = scalar_lea.hbm %s1134_s0, %s562_s1 }
  0x26   : > { %s153_s3 = sshll.u32 %s152_s9, 4  ;;  %s141_s6 = scalar_lea.sflag [#allocation3], %s140_s8  ;;  %s154_s3 = int_to_ptr.hbm [resolvable:$true] %s153_s3 }
  0x27   : > { %s1155_s17 = smov 4   ;;  %s1156_s22 = smov 64  }
  0x28   : > { %692 = dma.hbm_to_vmem [thread:$0]  (!%p690_p9), %s154_s3, 1024, %s156_s27, %s141_s6, %s1156_s22, %s1156_s22, %s1155_s17  }
  0x29   : > { %167 = sbr.rel (%p1013_p7) target bundleno = 275 (0x113), region = 28  ;;  %s1067_s29 = sand.u32 (!%p1013_p7), 1, %s906_s10  }
  0x2a   : > { %s564_s4 = sshll.u32 (!%p1013_p7), %s1067_s29, 6  ;;  %s170_s21 = scalar_lea.sflag (!%p1013_p7), [#allocation3], %s1067_s29 }
  0x2b   : > { %s1071_s1 = scalar_lea.vmem (!%p1013_p7), [#allocation2], %s564_s4 }
  0x2e   : > { %889 = dma.done.wait (%p1000_p3), %s170_s21, 1024  }
  0x2f   : > { %891 = vsyncadd (%p1000_p3), %s170_s21, 4294966272 }
  0x30   : > { %893 = dma.done.wait (%p994_p1), [#allocation6], 1024  }
  0x31   : > { %895 = vsyncadd (%p994_p1), [#allocation6], 4294966272  ;;  %v652_v0 = vld [vmem:[#allocation5 + $0x38] sm:$0xff]  ;;  %v651_v1 = vld [vmem:[#allocation5 + $0x30] sm:$0xff]  ;;  %s632_s9 = sshll.u32 %s918_s13, 1  ;;  %s566_s20 = sshll.u32 %s1067_s29, 1 }
  0x32   : > { %329 = vmatpush.bf16.msra.mxu0 %v652_v0  ;;  %653 = vmatpush.bf16.msra.mxu1 %v652_v0  ;;  %v650_v2 = vld [vmem:[#allocation5 + $0x28] sm:$0xff]  ;;  %v649_v3 = vld [vmem:[#allocation5 + $0x20] sm:$0xff]  ;;  %v648_v4 = vld [vmem:[#allocation5 + $0x18] sm:$0xff]  ;;  %s450_s19 = sadd.s32 %s914_s12, %s632_s9  ;;  %s199_s13 = scalar_lea.vmem [#allocation7], %s566_s20  ;;  %vm436_vm0 = vcmask 1040384  }
  0x33   : > { %654 = vmatpush.bf16.msra.mxu2 %v652_v0  ;;  %655 = vmatpush.bf16.msra.mxu3 %v652_v0  ;;  %v647_v5 = vld [vmem:[#allocation5 + $0x10] sm:$0xff]  ;;  %v646_v6 = vld [vmem:[#allocation5 + $0x8] sm:$0xff]  ;;  %v645_v7 = vld [vmem:[#allocation5] sm:$0xff]  ;;  %s633_s25 = sshll.u32 %s450_s19, 1  ;;  %s454_s8 = sshll.u32 %s199_s13, 4  ;;  %s455_s8 = int_to_ptr.vmem [resolvable:$true] %s454_s8 }
  0x34   : > { %v637_v8 = vld [vmem:[%s1071_s1] sm:$0xff]  ;;  %v639_v9 = vld [vmem:[%s1071_s1 + $0x10] sm:$0xff]  ;;  %v638_v12 = vld [vmem:[%s1071_s1 + $0x8] sm:$0xff]  ;;  %s452_s7 = scalar_lea.hbm %s1136_s2, %s633_s25  ;;  %s440_s18 = scalar_lea.sflag [#allocation4], %s1067_s29 }
  0x35   : > { %v641_v10 = vld [vmem:[%s1071_s1 + $0x20] sm:$0xff]  ;;  %v643_v11 = vld [vmem:[%s1071_s1 + $0x30] sm:$0xff]  ;;  %v640_v13 = vld [vmem:[%s1071_s1 + $0x18] sm:$0xff]  ;;  %s456_s12 = sshll.u32 %s452_s7, 4  ;;  %s848_s6 = scalar_lea.hbm %s1136_s2, 8  ;;  %s457_s12 = int_to_ptr.hbm [resolvable:$true] %s456_s12 }
  0x36   : > { %330 = vmatpush.bf16.msra.mxu0 %v651_v1  ;;  %656 = vmatpush.bf16.msra.mxu1 %v651_v1  ;;  %v642_v14 = vld [vmem:[%s1071_s1 + $0x28] sm:$0xff]  ;;  %v644_v15 = vld [vmem:[%s1071_s1 + $0x38] sm:$0xff]  ;;  %s842_s23 = sshra.s32 %s457_s12, 4  ;;  %s843_s23 = int_to_ptr.hbm [resolvable:$true] %s842_s23 }
  0x37   : > { %657 = vmatpush.bf16.msra.mxu2 %v651_v1  ;;  %658 = vmatpush.bf16.msra.mxu3 %v651_v1  ;;  %s844_s24 = scalar_lea.hbm %s843_s23, 2  ;;  %p849_p10 = scmp.lt.s32.totalorder %s843_s23, %s1136_s2 }
  0x38   : > { %p845_p1 = scmp.ne.s32.totalorder %s843_s23, %s844_s24  ;;  %p850_p11 = scmp.lt.s32.totalorder %s848_s6, %s844_s24 }
  0x3a   : > { %331 = vmatpush.bf16.msra.mxu0 %v650_v2  ;;  %659 = vmatpush.bf16.msra.mxu1 %v650_v2  ;;  %p846_p3 = pnand %p845_p1, %p1033_p2  ;;  %p851_p12 = por %p850_p11, %p849_p10 }
  0x3b   : > { %660 = vmatpush.bf16.msra.mxu2 %v650_v2  ;;  %661 = vmatpush.bf16.msra.mxu3 %v650_v2 }
  0x3c   : > { %p847_p7 = pneg %p846_p3 }
  0x3e   : > { %332 = vmatpush.bf16.msra.mxu0 %v649_v3  ;;  %662 = vmatpush.bf16.msra.mxu1 %v649_v3  ;;  %p852_p13 = pnand %p851_p12, %p847_p7 }
  0x3f   : > { %663 = vmatpush.bf16.msra.mxu2 %v649_v3  ;;  %664 = vmatpush.bf16.msra.mxu3 %v649_v3 }
  0x42   : > { %333 = vmatpush.bf16.msra.mxu0 %v648_v4  ;;  %665 = vmatpush.bf16.msra.mxu1 %v648_v4 }
  0x43   : > { %666 = vmatpush.bf16.msra.mxu2 %v648_v4  ;;  %667 = vmatpush.bf16.msra.mxu3 %v648_v4 }
  0x46   : > { %334 = vmatpush.bf16.msra.mxu0 %v647_v5  ;;  %668 = vmatpush.bf16.msra.mxu1 %v647_v5 }
  0x47   : > { %669 = vmatpush.bf16.msra.mxu2 %v647_v5  ;;  %670 = vmatpush.bf16.msra.mxu3 %v647_v5 }
  0x4a   : > { %335 = vmatpush.bf16.msra.mxu0 %v646_v6  ;;  %671 = vmatpush.bf16.msra.mxu1 %v646_v6 }
  0x4b   : > { %672 = vmatpush.bf16.msra.mxu2 %v646_v6  ;;  %673 = vmatpush.bf16.msra.mxu3 %v646_v6 }
  0x4e   : > { %336 = vmatpush.bf16.msra.mxu0 %v645_v7  ;;  %674 = vmatpush.bf16.msra.mxu1 %v645_v7 }
  0x4f   : > { %675 = vmatpush.bf16.msra.mxu2 %v645_v7  ;;  %676 = vmatpush.bf16.msra.mxu3 %v645_v7 }
  0x51   : > { %337 = vmatmul.bf16.vlgmr.msra.gmra.mxu0 %v637_v8  ;;  %347 = vmatmul.bf16.vlgmr.msra.gmra.mxu1 %v639_v9 }
  0x52   : > { %357 = vmatmul.bf16.vlgmr.msra.gmra.mxu2 %v641_v10  ;;  %367 = vmatmul.bf16.vlgmr.msra.gmra.mxu3 %v643_v11 }
  0x61   : > { %342 = vmatmul.bf16.gmra.mxu0 %v638_v12  ;;  %352 = vmatmul.bf16.gmra.mxu1 %v640_v13 }
  0x62   : > { %362 = vmatmul.bf16.gmra.mxu2 %v642_v14  ;;  %372 = vmatmul.bf16.gmra.mxu3 %v644_v15 }
  0xce   : > { %v338_v16 = vpop.f32.mrf.mxu0  ;;  %v348_v17 = vpop.f32.mrf.mxu1 }
  0xcf   : > { %v399_v26 = vmul.f32 %v338_v16, %v338_v16  ;;  %v403_v36 = vmul.f32 %v348_v17, %v348_v17 }
  0xd5   : > { %v358_v19 = vpop.f32.mrf.mxu2  ;;  %v368_v22 = vpop.f32.mrf.mxu3 }
  0xd6   : > { %v340_v18 = vpop.f32.mrf.mxu0  ;;  %v350_v20 = vpop.f32.mrf.mxu1  ;;  %v407_v50 = vmul.f32 %v358_v19, %v358_v19  ;;  %v411_v0 = vmul.f32 %v368_v22, %v368_v22 }
  0xd7   : > { %v400_v24 = vmul.f32 %v340_v18, %v340_v18  ;;  %v378_v27 = vadd.f32 %v340_v18, %v338_v16  ;;  %v404_v40 = vmul.f32 %v350_v20, %v350_v20 }
  0xd9   : > { %v415_v29 = vadd.f32 %v400_v24, %v399_v26 }
  0xdd   : > { %v360_v23 = vpop.f32.mrf.mxu2  ;;  %v370_v35 = vpop.f32.mrf.mxu3 }
  0xde   : > { %v343_v21 = vpop.f32.mrf.mxu0  ;;  %v353_v25 = vpop.f32.mrf.mxu1  ;;  %v408_v54 = vmul.f32 %v360_v23, %v360_v23  ;;  %v412_v3 = vmul.f32 %v370_v35, %v370_v35 }
  0xdf   : > { %v401_v28 = vmul.f32 %v343_v21, %v343_v21  ;;  %v379_v30 = vadd.f32 %v378_v27, %v343_v21  ;;  %v405_v44 = vmul.f32 %v353_v25, %v353_v25 }
  0xe1   : > { %v416_v32 = vadd.f32 %v415_v29, %v401_v28 }
  0xe5   : > { %v363_v39 = vpop.f32.mrf.mxu2  ;;  %v373_v53 = vpop.f32.mrf.mxu3 }
  0xe6   : > { %v345_v31 = vpop.f32.mrf.mxu0  ;;  %v355_v43 = vpop.f32.mrf.mxu1  ;;  %v409_v59 = vmul.f32 %v363_v39, %v363_v39  ;;  %v413_v8 = vmul.f32 %v373_v53, %v373_v53 }
  0xe7   : > { %v380_v33 = vadd.f32 %v379_v30, %v345_v31  ;;  %v402_v34 = vmul.f32 %v345_v31, %v345_v31  ;;  %v406_v48 = vmul.f32 %v355_v43, %v355_v43 }
  0xe9   : > { %v381_v37 = vadd.f32 %v380_v33, %v348_v17  ;;  %v417_v38 = vadd.f32 %v416_v32, %v402_v34 }
  0xeb   : > { %v418_v41 = vadd.f32 %v417_v38, %v403_v36  ;;  %v382_v42 = vadd.f32 %v381_v37, %v350_v20 }
  0xed   : > { %v383_v45 = vadd.f32 %v382_v42, %v353_v25  ;;  %v419_v46 = vadd.f32 %v418_v41, %v404_v40  ;;  %v365_v57 = vpop.f32.mrf.mxu2  ;;  %v375_v6 = vpop.f32.mrf.mxu3 }
  0xee   : > { %v410_v63 = vmul.f32 %v365_v57, %v365_v57  ;;  %v414_v12 = vmul.f32 %v375_v6, %v375_v6 }
  0xef   : > { %v384_v47 = vadd.f32 %v383_v45, %v355_v43  ;;  %v420_v49 = vadd.f32 %v419_v46, %v405_v44 }
  0xf1   : > { %v385_v51 = vadd.f32 %v384_v47, %v358_v19  ;;  %v421_v52 = vadd.f32 %v420_v49, %v406_v48 }
  0xf3   : > { %v422_v55 = vadd.f32 %v421_v52, %v407_v50  ;;  %v386_v56 = vadd.f32 %v385_v51, %v360_v23 }
  0xf5   : > { %v387_v58 = vadd.f32 %v386_v56, %v363_v39  ;;  %v423_v60 = vadd.f32 %v422_v55, %v408_v54 }
  0xf7   : > { %v424_v61 = vadd.f32 %v423_v60, %v409_v59  ;;  %v388_v62 = vadd.f32 %v387_v58, %v365_v57 }
  0xf9   : > { %v389_v1 = vadd.f32 %v388_v62, %v368_v22  ;;  %v425_v2 = vadd.f32 %v424_v61, %v410_v63 }
  0xfb   : > { %v426_v4 = vadd.f32 %v425_v2, %v411_v0  ;;  %v390_v5 = vadd.f32 %v389_v1, %v370_v35 }
  0xfd   : > { %v391_v7 = vadd.f32 %v390_v5, %v373_v53  ;;  %v427_v9 = vadd.f32 %v426_v4, %v412_v3 }
  0xff   : > { %v428_v10 = vadd.f32 %v427_v9, %v413_v8  ;;  %v392_v11 = vadd.f32 %v391_v7, %v375_v6 }
 0x101   : > { %v393_v13 = vrot.slane %v392_v11, 4  ;;  %v429_v14 = vadd.f32 %v428_v10, %v414_v12 }
 0x103   : > { %v394_v15 = vadd.f32 %v393_v13, %v392_v11  ;;  %v430_v16 = vrot.slane %v429_v14, 4 }
 0x105   : > { %v395_v17 = vrot.slane %v394_v15, 2  ;;  %v431_v18 = vadd.f32 %v430_v16, %v429_v14 }
 0x107   : > { %v396_v19 = vadd.f32 %v395_v17, %v394_v15  ;;  %v432_v20 = vrot.slane %v431_v18, 2 }
 0x109   : > { %v397_v21 = vrot.slane %v396_v19, 1  ;;  %v433_v22 = vadd.f32 %v432_v20, %v431_v18 }
 0x10b   : > { %v434_v23 = vrot.slane %v433_v22, 1  ;;  %v398_v24 = vadd.f32 %v397_v21, %v396_v19 }
 0x10d   : > { %v435_v25 = vadd.f32 %v434_v23, %v433_v22 }
 0x10f   : > { %v437_v26 = vsel %vm436_vm0, %v398_v24, %v435_v25 }
 0x110   : > { %438 = vst [vmem:[%s199_s13] sm:$0x3] %v437_v26 }
 0x111   : > { %855 = shalt.err (!%p852_p13)
}
 0x112   : > { %683 = dma.vmem_to_hbm [thread:$0]  (%p1033_p2), %s455_s8, 32, %s457_s12, %s440_s18  }
 0x113 PF: > { %s1157_s29 = sld [smem:[#allocation11_spill]]  ;;  %p700_p0 = scmp.ge.s32.totalorder %s930_s16, 2 }
 0x115   : > { %p694_p4 = pnand %p700_p0, %p1005_p5 }
 0x117   : > { %p695_p6 = pneg %p694_p4 }
 0x119   : > { %s468_s21 = sand.u32 1, %s1157_s29  }
 0x11a   : > { %s469_s1 = scalar_lea.sflag [#allocation4], %s468_s21 }
 0x11b   : > { %897 = dma.done.wait (%p695_p6), %s469_s1, 32  }
 0x11c   : > { %899 = vsyncadd (%p695_p6), %s469_s1, 4294967264  ;;  %s19_s16 = sadd.s32 1, %s930_s16   ;;  %s1159_s5 = sld [smem:[#allocation13_spill]] }
 0x11d   : > { %p16_p8 = scmp.ge.s32.totalorder %s19_s16, 6   ;;  %s1160_s19 = sld [smem:[#allocation14_spill]] }
 0x11e   : > { %s1161_s9 = smov %s906_s10  ;;  %s1162_s10 = smov %s910_s11 }
 0x11f   : > { %s1163_s11 = smov %s1052_s28  ;;  %s1164_s12 = smov %s922_s14 }
 0x120   : > { %s1165_s13 = smov %s926_s15  ;;  %18 = sbr.rel (!%p16_p8) target bundleno = 10 (0xa), region = 77 }
 0x122   : > { %s1166_s14 = smov %s1159_s5 }
 0x123   : > { %s1167_s15 = smov %s1160_s19 }
 0x125   :  { %475 = vsyncpa [#allocation3], 1 }
 0x126   :  { %477 = vsyncpa [#allocation3 + $0x1], 1 }
 0x127   :  { %478 = vsyncpa [#allocation6], 1 }
 0x128   :  { %479 = vsyncpa [#allocation4], 1 }
 0x129   :  { %481 = vsyncpa [#allocation4 + $0x1], 1 }

</bundles_post_ra>
